<compile_context>
chip_gen: v7x
topology: tpu7x:2x2x1
jax: 0.10.0
libtpu: 0.0.40
codegen_flags: <defaults>
</compile_context>

<pallas_src>
import jax
import jax.numpy as jnp
from jax.experimental import pallas as pl
from jax.experimental.pallas import tpu as pltpu


def gaussian_fused_kernel(x_ref, w_ref, b_ref, eps_ref,
                          sample_ref, mean_ref, logvar_ref):
    """Single-step path: logits, std, and all l samples in one shot."""
    out_dim = mean_ref.shape[-1]
    logits = jnp.dot(x_ref[...], w_ref[...],
                     preferred_element_type=jnp.float32) + b_ref[...]  # (B, 2*out_dim)
    mean = logits[:, :out_dim]          # lane-aligned static split (out_dim % 128 == 0)
    logvar = logits[:, out_dim:]
    std = jnp.exp(0.5 * logvar)
    # (l, B, out_dim) = (1, B, out_dim) broadcast against eps
    sample_ref[...] = mean[None, :, :] + eps_ref[...] * std[None, :, :]
    mean_ref[...] = mean
    logvar_ref[...] = logvar


def gaussian_looped_kernel(x_ref, w_ref, b_ref, eps_ref,
                           sample_ref, mean_ref, logvar_ref,
                           mean_sc, std_sc):
    """Grid over l: matmul/exp hoisted to step 0, per-step work is one FMA."""
    out_dim = mean_ref.shape[-1]

    @pl.when(pl.program_id(0) == 0)
    def _():
        logits = jnp.dot(x_ref[...], w_ref[...],
                         preferred_element_type=jnp.float32) + b_ref[...]
        mean = logits[:, :out_dim]
        logvar = logits[:, out_dim:]
        mean_sc[...] = mean
        std_sc[...] = jnp.exp(0.5 * logvar)
        # mean/logvar out-blocks are resident across the whole grid; write once.
        mean_ref[...] = mean
        logvar_ref[...] = logvar

    sample_ref[0] = mean_sc[...] + eps_ref[0] * std_sc[...]


def gaussian_forward(x, weight, bias, eps, out_dim, *, eps_vmem_budget_bytes=8 << 20):
    """weight: (in_dim, 2*out_dim) (transposed vs. PyTorch nn.Linear),
       bias:   (2*out_dim,),
       eps:    (l, B, out_dim) standard-normal noise (glue-side RNG, mirrors
               torch.randn_like).  Returns (stack(samples).squeeze(), mean, logvar)."""
    B, in_dim = x.shape
    l = eps.shape[0]
    b2 = bias.reshape(1, 2 * out_dim)

    cost = pl.CostEstimate(
        flops=2 * B * in_dim * (2 * out_dim) + 4 * l * B * out_dim,
        transcendentals=B * out_dim,
        bytes_accessed=4 * (x.size + weight.size + bias.size + eps.size
                            + l * B * out_dim + 2 * B * out_dim),
    )
    out_shape = (
        jax.ShapeDtypeStruct((l, B, out_dim), jnp.float32),   # samples
        jax.ShapeDtypeStruct((B, out_dim), jnp.float32),      # mean
        jax.ShapeDtypeStruct((B, out_dim), jnp.float32),      # logvar
    )

    # eps + samples resident together in VMEM on the fused path.
    fused_bytes = 2 * l * B * out_dim * 4

    if fused_bytes <= eps_vmem_budget_bytes:
        # --- small l: one step, no grid machinery overhead ---
        samples, mean, logvar = pl.pallas_call(
            gaussian_fused_kernel,
            out_shape=out_shape,
            grid=(1,),
            in_specs=[
                pl.BlockSpec((B, in_dim), lambda i: (0, 0)),            # x
                pl.BlockSpec((in_dim, 2 * out_dim), lambda i: (0, 0)),  # W (unsplit)
                pl.BlockSpec((1, 2 * out_dim), lambda i: (0, 0)),       # b (unsplit)
                pl.BlockSpec((l, B, out_dim), lambda i: (0, 0, 0)),     # eps (all l)
            ],
            out_specs=(
                pl.BlockSpec((l, B, out_dim), lambda i: (0, 0, 0)),     # samples
                pl.BlockSpec((B, out_dim), lambda i: (0, 0)),           # mean
                pl.BlockSpec((B, out_dim), lambda i: (0, 0)),           # logvar
            ),
            compiler_params=pltpu.CompilerParams(
                dimension_semantics=("arbitrary",)),
            cost_estimate=cost,
        )(x, weight, b2, eps)
    else:
        # --- large l: grid over samples, loop-invariant work hoisted to step 0 ---
        samples, mean, logvar = pl.pallas_call(
            gaussian_looped_kernel,
            out_shape=out_shape,
            grid=(l,),
            in_specs=[
                pl.BlockSpec((B, in_dim), lambda i: (0, 0)),            # x (resident)
                pl.BlockSpec((in_dim, 2 * out_dim), lambda i: (0, 0)),  # W (resident)
                pl.BlockSpec((1, 2 * out_dim), lambda i: (0, 0)),       # b (resident)
                pl.BlockSpec((1, B, out_dim), lambda i: (i, 0, 0)),     # eps slice i
            ],
            out_specs=(
                pl.BlockSpec((1, B, out_dim), lambda i: (i, 0, 0)),     # samples slice i
                pl.BlockSpec((B, out_dim), lambda i: (0, 0)),           # mean (resident)
                pl.BlockSpec((B, out_dim), lambda i: (0, 0)),           # logvar (resident)
            ),
            scratch_shapes=[
                pltpu.VMEM((B, out_dim), jnp.float32),   # mean scratch
                pltpu.VMEM((B, out_dim), jnp.float32),   # std scratch
            ],
            compiler_params=pltpu.CompilerParams(
                dimension_semantics=("arbitrary",)),
            cost_estimate=cost,
        )(x, weight, b2, eps)

    # Match torch.stack(tmp, 0).squeeze(): drops ALL size-1 dims (shape trap for
    # B==1 / out_dim==1, but that is the reference module's semantics).
    return jnp.squeeze(samples), mean, logvar


if __name__ == "__main__":
    B, in_dim, out_dim = 8, 32, 128
    key = jax.random.PRNGKey(0)
    k1, k2, k3, k4, k5 = jax.random.split(key, 5)

    x = jax.random.normal(k1, (B, in_dim), jnp.float32)
    weight = jax.random.normal(k2, (in_dim, 2 * out_dim), jnp.float32) * 0.05
    bias = jax.random.normal(k3, (2 * out_dim,), jnp.float32) * 0.01

    # Pure-JAX reference.
    logits_ref = x @ weight + bias
    mean_r, logvar_r = logits_ref[:, :out_dim], logits_ref[:, out_dim:]
    std_r = jnp.exp(0.5 * logvar_r)

    # --- l = 1 (common case): fused single-step path ---
    l = 1
    eps = jax.random.normal(k4, (l, B, out_dim), jnp.float32)
    sample, mean, logvar = gaussian_forward(x, weight, bias, eps, out_dim)
    jax.block_until_ready((sample, mean, logvar))

    sample_r = jnp.squeeze(mean_r[None] + eps * std_r[None])
    assert jnp.allclose(mean, mean_r, atol=1e-5)
    assert jnp.allclose(logvar, logvar_r, atol=1e-5)
    assert jnp.allclose(sample, sample_r, atol=1e-5)

    # --- l = 4: force the hoisted-matmul grid path to exercise it as well ---
    l2 = 4
    eps2 = jax.random.normal(k5, (l2, B, out_dim), jnp.float32)
    sample2, mean2, logvar2 = gaussian_forward(
        x, weight, bias, eps2, out_dim, eps_vmem_budget_bytes=0)
    jax.block_until_ready((sample2, mean2, logvar2))

    sample2_r = mean_r[None] + eps2 * std_r[None]
    assert jnp.allclose(mean2, mean_r, atol=1e-5)
    assert jnp.allclose(logvar2, logvar_r, atol=1e-5)
    assert jnp.allclose(sample2, sample2_r, atol=1e-5)

    print("KERNEL_OK")
</pallas_src>

<mosaic_0001>
module attributes {stable_mosaic.version = 11 : i64} {
  func.func @gaussian_fused_kernel(%arg0: i32, %arg1: memref<8x32xf32, #tpu.memory_space<vmem>>, %arg2: memref<32x256xf32, #tpu.memory_space<vmem>>, %arg3: memref<1x256xf32, #tpu.memory_space<vmem>>, %arg4: memref<1x8x128xf32, #tpu.memory_space<vmem>>, %arg5: memref<1x8x128xf32, #tpu.memory_space<vmem>>, %arg6: memref<8x128xf32, #tpu.memory_space<vmem>>, %arg7: memref<8x128xf32, #tpu.memory_space<vmem>>) attributes {dimension_semantics = [#tpu.dimension_semantics<arbitrary>], iteration_bounds = array<i64: 1>, scalar_prefetch = 0 : i64, scratch_operands = 0 : i64, tpu.core_type = #tpu.core_type<tc>, window_params = [{pipeline_mode = #tpu.pipeline_mode<synchronous>, transform_indices = @transform_0, window_bounds = array<i64: 8, 32>}, {pipeline_mode = #tpu.pipeline_mode<synchronous>, transform_indices = @transform_1, window_bounds = array<i64: 32, 256>}, {pipeline_mode = #tpu.pipeline_mode<synchronous>, transform_indices = @transform_2, window_bounds = array<i64: 1, 256>}, {pipeline_mode = #tpu.pipeline_mode<synchronous>, transform_indices = @transform_3, window_bounds = array<i64: 1, 8, 128>}, {pipeline_mode = #tpu.pipeline_mode<synchronous>, transform_indices = @transform_4, window_bounds = array<i64: 1, 8, 128>}, {pipeline_mode = #tpu.pipeline_mode<synchronous>, transform_indices = @transform_5, window_bounds = array<i64: 8, 128>}, {pipeline_mode = #tpu.pipeline_mode<synchronous>, transform_indices = @transform_6, window_bounds = array<i64: 8, 128>}]} {
    %c0 = arith.constant 0 : index
    %c0_0 = arith.constant 0 : index
    %0 = vector.load %arg1[%c0, %c0_0] : memref<8x32xf32, #tpu.memory_space<vmem>>, vector<8x32xf32>
    %c0_1 = arith.constant 0 : index
    %c0_2 = arith.constant 0 : index
    %1 = vector.load %arg2[%c0_1, %c0_2] : memref<32x256xf32, #tpu.memory_space<vmem>>, vector<32x256xf32>
    %cst = arith.constant dense<0.000000e+00> : vector<8x256xf32>
    %2 = tpu.matmul %0, %1, %cst {dimension_numbers = #tpu.dot_dimension_numbers<[1], [0], [0], [1], [0, 0, 1, 1], [], []>} : vector<8x32xf32>, vector<32x256xf32>, vector<8x256xf32> -> vector<8x256xf32>
    %c0_3 = arith.constant 0 : index
    %c0_4 = arith.constant 0 : index
    %3 = vector.load %arg3[%c0_3, %c0_4] : memref<1x256xf32, #tpu.memory_space<vmem>>, vector<1x256xf32>
    %4 = vector.broadcast %3 : vector<1x256xf32> to vector<8x256xf32>
    %5 = arith.addf %2, %4 : vector<8x256xf32>
    %6 = vector.extract_strided_slice %5 {offsets = [0, 0], sizes = [8, 128], strides = [1, 1]} : vector<8x256xf32> to vector<8x128xf32>
    %7 = vector.extract_strided_slice %5 {offsets = [0, 128], sizes = [8, 128], strides = [1, 1]} : vector<8x256xf32> to vector<8x128xf32>
    %cst_5 = arith.constant 5.000000e-01 : f32
    %8 = vector.broadcast %cst_5 : f32 to vector<8x128xf32>
    %9 = arith.mulf %8, %7 : vector<8x128xf32>
    %10 = math.exp %9 : vector<8x128xf32>
    %11 = vector.shape_cast %6 : vector<8x128xf32> to vector<1x8x128xf32>
    %c0_6 = arith.constant 0 : index
    %c0_7 = arith.constant 0 : index
    %c0_8 = arith.constant 0 : index
    %12 = vector.load %arg4[%c0_6, %c0_7, %c0_8] : memref<1x8x128xf32, #tpu.memory_space<vmem>>, vector<1x8x128xf32>
    %13 = vector.shape_cast %10 : vector<8x128xf32> to vector<1x8x128xf32>
    %14 = arith.mulf %12, %13 : vector<1x8x128xf32>
    %15 = arith.addf %11, %14 : vector<1x8x128xf32>
    %c0_9 = arith.constant 0 : index
    %c0_10 = arith.constant 0 : index
    %c0_11 = arith.constant 0 : index
    %16 = vector.load %arg5[%c0_9, %c0_10, %c0_11] : memref<1x8x128xf32, #tpu.memory_space<vmem>>, vector<1x8x128xf32>
    tpu.vector_store %arg5[%c0_9, %c0_10, %c0_11], %15 {strides = array<i32>} : memref<1x8x128xf32, #tpu.memory_space<vmem>>, vector<1x8x128xf32>,
    %c0_12 = arith.constant 0 : index
    %c0_13 = arith.constant 0 : index
    %17 = vector.load %arg6[%c0_12, %c0_13] : memref<8x128xf32, #tpu.memory_space<vmem>>, vector<8x128xf32>
    tpu.vector_store %arg6[%c0_12, %c0_13], %6 {strides = array<i32>} : memref<8x128xf32, #tpu.memory_space<vmem>>, vector<8x128xf32>,
    %c0_14 = arith.constant 0 : index
    %c0_15 = arith.constant 0 : index
    %18 = vector.load %arg7[%c0_14, %c0_15] : memref<8x128xf32, #tpu.memory_space<vmem>>, vector<8x128xf32>
    tpu.vector_store %arg7[%c0_14, %c0_15], %7 {strides = array<i32>} : memref<8x128xf32, #tpu.memory_space<vmem>>, vector<8x128xf32>,
    return
  }
  func.func @transform_0(%arg0: i32) -> (i32, i32) {
    %c0_i32 = arith.constant 0 : i32
    %c0_i32_0 = arith.constant 0 : i32
    %c0_i32_1 = arith.constant 0 : i32
    return %c0_i32, %c0_i32_0 : i32, i32
  }
  func.func @transform_1(%arg0: i32) -> (i32, i32) {
    %c0_i32 = arith.constant 0 : i32
    %c0_i32_0 = arith.constant 0 : i32
    %c0_i32_1 = arith.constant 0 : i32
    return %c0_i32, %c0_i32_0 : i32, i32
  }
  func.func @transform_2(%arg0: i32) -> (i32, i32) {
    %c0_i32 = arith.constant 0 : i32
    %c0_i32_0 = arith.constant 0 : i32
    %c0_i32_1 = arith.constant 0 : i32
    return %c0_i32, %c0_i32_0 : i32, i32
  }
  func.func @transform_3(%arg0: i32) -> (i32, i32, i32) {
    %c0_i32 = arith.constant 0 : i32
    %c0_i32_0 = arith.constant 0 : i32
    %c0_i32_1 = arith.constant 0 : i32
    %c0_i32_2 = arith.constant 0 : i32
    return %c0_i32, %c0_i32_0, %c0_i32_1 : i32, i32, i32
  }
  func.func @transform_4(%arg0: i32) -> (i32, i32, i32) {
    %c0_i32 = arith.constant 0 : i32
    %c0_i32_0 = arith.constant 0 : i32
    %c0_i32_1 = arith.constant 0 : i32
    %c0_i32_2 = arith.constant 0 : i32
    return %c0_i32, %c0_i32_0, %c0_i32_1 : i32, i32, i32
  }
  func.func @transform_5(%arg0: i32) -> (i32, i32) {
    %c0_i32 = arith.constant 0 : i32
    %c0_i32_0 = arith.constant 0 : i32
    %c0_i32_1 = arith.constant 0 : i32
    return %c0_i32, %c0_i32_0 : i32, i32
  }
  func.func @transform_6(%arg0: i32) -> (i32, i32) {
    %c0_i32 = arith.constant 0 : i32
    %c0_i32_0 = arith.constant 0 : i32
    %c0_i32_1 = arith.constant 0 : i32
    return %c0_i32, %c0_i32_0 : i32, i32
  }
}

</mosaic_0001>

<bundles_post_ra>
// kernel: tpu_custom_call.1
= control target key start
LH: loop header
LB: loop body
LE: loop exit
PB: predicated region body
PF: predicated region fallthrough
CT: control target
= control target key end

     0   :  { %12 = vsyncpa [#allocation3], 0  ;;  %s456_s0 = inlined_call_operand.hbm [shape: f32[8,32], index: 0, kind: input, shape index: {}]   ;;  %s457_s1 = inlined_call_operand.hbm [shape: f32[32,256], index: 1, kind: input, shape index: {}]   ;;  %s458_s2 = inlined_call_operand.vmem [shape: f32[1,256], index: 2, kind: input, shape index: {}]   ;;  %s459_s3 = inlined_call_operand.vmem [shape: f32[1,8,128], index: 3, kind: input, shape index: {}]   ;;  %s460_s4 = inlined_call_operand.hbm [shape: f32[1,8,128], index: 4, kind: output, shape index: {0}]   ;;  %s461_s5 = inlined_call_operand.hbm [shape: f32[8,128], index: 5, kind: output, shape index: {1}]   ;;  %s462_s6 = inlined_call_operand.hbm [shape: f32[8,128], index: 6, kind: output, shape index: {2}]  }
   0x1   :  { %13 = vsyncpa [#allocation6], 0 }
   0x2   :  { %14 = vsyncpa [#allocation4], 0 }
   0x3   :  { %15 = vsyncpa [#allocation9], 0  ;;  %s333_s21 = smov [#allocation2]   ;;  %s334_s23 = smov [#allocation5]  }
   0x4   :  { %s22_s22 = sshll.u32 %s333_s21, 4  ;;  %s31_s24 = sshll.u32 %s334_s23, 4  ;;  %s23_s22 = int_to_ptr.vmem [resolvable:$true] %s22_s22  ;;  %s376_s24 = int_to_ptr.vmem [resolvable:$true] %s31_s24 }
   0x5   :  { %s215_s27 = scalar_lea.hbm %s456_s0, 128 }
   0x6   :  { %p216_p0 = scmp.ne.s32.totalorder %s456_s0, %s215_s27  ;;  %p219_p1 = scmp.lt.u32.totalorder %s215_s27, %s456_s0 }
   0x8   :  { %p221_p2 = pnand %p219_p1, %p216_p0 }
   0xa   :  { %224 = shalt.err (!%p221_p2)
}
   0xb   :  { %s225_s8 = scalar_lea.vmem %s23_s22, 128  ;;  %p230_p4 = scmp.lt.s32.totalorder %s23_s22, %s23_s22 }
   0xc   :  { %p226_p3 = scmp.ne.s32.totalorder %s23_s22, %s225_s8  ;;  %p231_p5 = scmp.lt.s32.totalorder %s225_s8, %s225_s8 }
   0xe   :  { %p232_p6 = por %p231_p5, %p230_p4 }
  0x10   :  { %p233_p7 = pnand %p232_p6, %p226_p3 }
  0x12   :  { %236 = shalt.err (!%p233_p7)
}
  0x13   :  { %25 = dma.hbm_to_vmem [thread:$0]  %s456_s0, 128, %s23_s22, [#allocation3]  }
  0x14   :  { %s237_s13 = scalar_lea.hbm %s457_s1, 1024 }
  0x15   :  { %p238_p8 = scmp.ne.s32.totalorder %s457_s1, %s237_s13  ;;  %p241_p9 = scmp.lt.u32.totalorder %s237_s13, %s457_s1 }
  0x17   :  { %p243_p10 = pnand %p241_p9, %p238_p8 }
  0x19   :  { %246 = shalt.err (!%p243_p10)
}
  0x1a   :  { %s247_s18 = scalar_lea.vmem %s376_s24, 1024  ;;  %p252_p12 = scmp.lt.s32.totalorder %s376_s24, %s376_s24 }
  0x1b   :  { %p248_p11 = scmp.ne.s32.totalorder %s376_s24, %s247_s18  ;;  %p253_p13 = scmp.lt.s32.totalorder %s247_s18, %s247_s18 }
  0x1d   :  { %p254_p0 = por %p253_p13, %p252_p12 }
  0x1f   :  { %p255_p1 = pnand %p254_p0, %p248_p11 }
  0x21   :  { %258 = shalt.err (!%p255_p1)
}
  0x22   :  { %s335_s0 = smov 256   ;;  %s336_s19 = smov 16  }
  0x23   :  { %37 = dma.hbm_to_vmem [thread:$0]  %s457_s1, 1024, %s376_s24, [#allocation6], %s335_s0, %s335_s0, %s336_s19  }
  0x24   :  { %325 = dma.done.wait [#allocation3], 128  }
  0x25   :  { %326 = vsyncadd [#allocation3], 4294967168 }
  0x26   :  { %327 = dma.done.wait [#allocation6], 1024  }
  0x27   :  { %328 = vsyncadd [#allocation6], 4294966272  ;;  %v337_v0 = vmov 0.0   ;;  %v50_v1 = vld [vmem:[#allocation5 + $0x8] sm:$0xff]  ;;  %v52_v2 = vld [vmem:[#allocation5 + $0x18] sm:$0xff]  ;;  %vm69_vm0 = vcmask 261120   ;;  %v59_v14 = vlaneseq }
  0x28   :  { %137 = vmatprep.mubr.f32.mxu0 %v337_v0  ;;  %v49_v3 = vld [vmem:[#allocation5] sm:$0xff]  ;;  %v197_v4 = vpack.c.bf16 %v52_v2, %v50_v1  ;;  %v51_v5 = vld [vmem:[#allocation5 + $0x10] sm:$0xff]  ;;  %v54_v6 = vld [vmem:[#allocation5 + $0x28] sm:$0xff]  ;;  %s338_s23 = smov [#allocation8]   ;;  %s339_s25 = smov [#allocation10]  }
  0x29   :  { %v56_v7 = vld [vmem:[#allocation5 + $0x38] sm:$0xff]  ;;  %v199_v8 = vpack.c.bf16 %v51_v5, %v49_v3  ;;  %v53_v10 = vld [vmem:[#allocation5 + $0x20] sm:$0xff]  ;;  %v55_v11 = vld [vmem:[#allocation5 + $0x30] sm:$0xff]  ;;  %v60_v15 = vshrl.u32 %v59_v14, 7  ;;  %s169_s24 = sshll.u32 %s338_s23, 4  ;;  %s179_s26 = sshll.u32 %s339_s25, 4  ;;  %s170_s24 = int_to_ptr.vmem [resolvable:$true] %s169_s24  ;;  %s410_s26 = int_to_ptr.vmem [resolvable:$true] %s179_s26 }
  0x2a   :  { %v201_v9 = vpack.c.bf16 %v56_v7, %v54_v6  ;;  %198 = vmatprep.subr.bf16.mxu0 %v197_v4  ;;  %v203_v12 = vpack.c.bf16 %v55_v11, %v53_v10  ;;  %v48_v13 = vld [vmem:[#allocation2] sm:$0xff]  ;;  %s259_s27 = scalar_lea.vmem %s170_s24, 128  ;;  %p264_p3 = scmp.lt.s32.totalorder %s170_s24, %s170_s24 }
  0x2b   :  { %200 = vmatpush1.bf16.msra.mxu0 %v199_v8  ;;  %v61_v16 = vsub.s32 0, %v60_v15  ;;  %v57_v17 = vld [vmem:[%s458_s2] sm:$0x3]  ;;  %v65_v18 = vsub.s32 1, %v60_v15  ;;  %p260_p2 = scmp.ne.s32.totalorder %s170_s24, %s259_s27  ;;  %p265_p4 = scmp.lt.s32.totalorder %s259_s27, %s259_s27 }
  0x2c   :  { %202 = vmatprep.subr.bf16.mxu0 %v201_v9 }
  0x2d   :  { %v62_v19 = vrot.slane %v57_v17, %v61_v16  ;;  %v66_v20 = vrot.slane %v57_v17, %v65_v18  ;;  %p266_p5 = por %p265_p4, %p264_p3 }
  0x2f   :  { %204 = vmatpush1.bf16.msra.mxu0 %v203_v12  ;;  %p267_p6 = pnand %p266_p5, %p260_p2 }
  0x32   :  { %196 = vmatmul.mubr.msk.f32.vlgmr.msra.gmra.mrb[0].mxu0 %vm69_vm0, %v48_v13 }
 0x105   :  { %v139_v21 = vpop.f32.mrb[0].mxu0 }
 0x106   :  { %v140_v22 = vadd.f32 %v139_v21, %v62_v19  ;;  %v141_v23 = vpop.f32.mrb[1].mxu0 }
 0x107   :  { %v142_v24 = vadd.f32 %v141_v23, %v66_v20 }
 0x108   :  { %151 = vst [vmem:[#allocation8] sm:$0xff] %v140_v22 }
 0x109   :  { %v144_v25 = vmul.f32 0.5, %v142_v24  ;;  %152 = vst [vmem:[#allocation10] sm:$0xff] %v142_v24 }
 0x10a   :  { %270 = shalt.err (!%p267_p6)
}
 0x10b   :  { %s271_s29 = scalar_lea.hbm %s461_s5, 128 }
 0x10c   :  { %p272_p7 = scmp.ne.s32.totalorder %s461_s5, %s271_s29  ;;  %p275_p8 = scmp.lt.u32.totalorder %s271_s29, %s461_s5 }
 0x10e   :  { %p277_p9 = pnand %p275_p8, %p272_p7 }
 0x110   :  { %280 = shalt.err (!%p277_p9)
}
 0x111   :  { %172 = dma.vmem_to_hbm [thread:$0]  %s170_s24, 128, %s461_s5, [#allocation9]  }
 0x112   :  { %s281_s12 = scalar_lea.vmem %s410_s26, 128  ;;  %p286_p11 = scmp.lt.s32.totalorder %s410_s26, %s410_s26 }
 0x113   :  { %p282_p10 = scmp.ne.s32.totalorder %s410_s26, %s281_s12  ;;  %p287_p12 = scmp.lt.s32.totalorder %s281_s12, %s281_s12 }
 0x115   :  { %p288_p13 = por %p287_p12, %p286_p11 }
 0x117   :  { %p289_p0 = pnand %p288_p13, %p282_p10 }
 0x119   :  { %292 = shalt.err (!%p289_p0)
}
 0x11a   :  { %s293_s15 = scalar_lea.hbm %s462_s6, 128 }
 0x11b   :  { %p294_p1 = scmp.ne.s32.totalorder %s462_s6, %s293_s15  ;;  %p297_p2 = scmp.lt.u32.totalorder %s293_s15, %s462_s6 }
 0x11d   :  { %p299_p3 = pnand %p297_p2, %p294_p1 }
 0x11f   :  { %302 = shalt.err (!%p299_p3)
}
 0x120   :  { %182 = dma.vmem_to_hbm [thread:$0]  %s410_s26, 128, %s462_s6, [#allocation9]   ;;  %v145_v26 = vmul.f32 1.442695, %v144_v25  ;;  %v147_v27 = vld [vmem:[%s459_s3] sm:$0xff] }
 0x121   :  { %s340_s1 = smov [#allocation7]  }
 0x122   :  { %213 = vpow2.f32 %v145_v26  ;;  %s159_s22 = sshll.u32 %s340_s1, 4  ;;  %s160_s22 = int_to_ptr.vmem [resolvable:$true] %s159_s22 }
 0x123   :  { %s303_s23 = scalar_lea.vmem %s160_s22, 128  ;;  %p308_p5 = scmp.lt.s32.totalorder %s160_s22, %s160_s22 }
 0x124   :  { %p304_p4 = scmp.ne.s32.totalorder %s160_s22, %s303_s23  ;;  %p309_p6 = scmp.lt.s32.totalorder %s303_s23, %s303_s23 }
 0x126   :  { %p310_p7 = por %p309_p6, %p308_p5 }
 0x128   :  { %p311_p8 = pnand %p310_p7, %p304_p4 }
 0x12c   :  { %v214_v28 = vpop.eup %213 }
 0x12d   :  { %v148_v29 = vmul.f32 %v214_v28, %v147_v27 }
 0x12f   :  { %v149_v30 = vadd.f32 %v148_v29, %v140_v22 }
 0x131   :  { %150 = vst [vmem:[#allocation7] sm:$0xff] %v149_v30 }
 0x132   :  { %314 = shalt.err (!%p311_p8)
}
 0x133   :  { %s315_s25 = scalar_lea.hbm %s460_s4, 128 }
 0x134   :  { %p316_p9 = scmp.ne.s32.totalorder %s460_s4, %s315_s25  ;;  %p319_p10 = scmp.lt.u32.totalorder %s315_s25, %s460_s4 }
 0x136   :  { %p321_p11 = pnand %p319_p10, %p316_p9 }
 0x138   :  { %324 = shalt.err (!%p321_p11)
}
 0x139   :  { %162 = dma.vmem_to_hbm [thread:$0]  %s160_s22, 128, %s460_s4, [#allocation4]  }
 0x13a   :  { %329 = dma.done.wait [#allocation4], 128  }
 0x13b   :  { %330 = vsyncadd [#allocation4], 4294967168 }
 0x13c   :  { %331 = dma.done.wait [#allocation9], 256  }
 0x13d   :  { %332 = vsyncadd [#allocation9], 4294967040 }
 0x13e   :  { %192 = vsyncpa [#allocation3], 1 }
 0x13f   :  { %193 = vsyncpa [#allocation6], 1 }
 0x140   :  { %194 = vsyncpa [#allocation4], 1 }
 0x141   :  { %195 = vsyncpa [#allocation9], 1 }

</bundles_post_ra>
